<compile_context>
chip_gen: v7x
topology: tpu7x:2x2x1
jax: 0.10.0
libtpu: 0.0.40
codegen_flags: <defaults>
</compile_context>

<pallas_src>
import jax
import jax.numpy as jnp
import numpy as np
from jax.experimental import pallas as pl
from jax.experimental.pallas import tpu as pltpu

# Small demo sizes consistent with the module (SEQ_LEN = maxlen + 1).
B = 2          # batch
SEQ_LEN = 8    # maxlen + 1 (small demo value)
K = 200        # conv kernel width, fixed by Conv2d(1, 1, (1, 200))
FC1 = 512
H_DIM = 100
OUT_DIM = 10

# Lane-aligned (multiple-of-128) padded sizes used inside the kernel.
H_PAD = 128
OUT_PAD = 128
MAX_TILE_B = 512   # cap keeps double-buffered f32 x tile under v5e's 16 MiB scoped VMEM


def _cdiv(a, b):
    return -(-a // b)


def _round8(a):
    return _cdiv(a, 8) * 8


def _pick_tile_b(batch):
    """Large, sublane-aligned batch tiles; >=2 grid steps when possible (v7x megacore)."""
    b8 = _round8(batch)
    if b8 >= 16:
        tile = min(MAX_TILE_B, _round8(_cdiv(b8, 2)))
    else:
        tile = min(MAX_TILE_B, b8)
    return max(tile, 8)


def out_cnn_kernel(x_ref, wbd_ref, bc_ref,
                   w1_ref, b1_ref, w2_ref, b2_ref, w3_ref, b3_ref,
                   o_ref):
    # x_ref:  (TILE_B, SEQ_LEN*K) f32    wbd_ref: (SEQ_LEN*K, SEQ_LEN) bf16 block-diagonal
    # bc_ref: (1, 1) f32 in SMEM         o_ref:   (TILE_B, OUT_PAD) bf16
    xb = x_ref[...].astype(jnp.bfloat16)                       # single downcast, halves live bytes

    # Conv2d(1,1,(1,200)) as ONE block-diagonal MXU matmul:
    #   conv[b, s] = sum_k x[b, s*K + k] * wc[k]
    conv = jnp.dot(xb, wbd_ref[...],
                   preferred_element_type=jnp.float32) + bc_ref[0, 0]
    h0 = jnp.maximum(conv, 0.0).astype(jnp.bfloat16)           # (TILE_B, SEQ_LEN)

    # fc1 + ReLU  (dropout p=0.0 -> identity)
    h1 = jnp.dot(h0, w1_ref[...], preferred_element_type=jnp.float32) + b1_ref[...]
    h1 = jnp.maximum(h1, 0.0)                                  # (TILE_B, 512) f32

    # fc2 + ReLU  (dropout p=0.0 -> identity); padded lanes stay exactly 0.
    h2 = jnp.dot(h1.astype(jnp.bfloat16), w2_ref[...],
                 preferred_element_type=jnp.float32) + b2_ref[...]
    h2 = jnp.maximum(h2, 0.0)                                  # (TILE_B, H_PAD) f32

    # fc3 into a lane-dense (TILE_B, OUT_PAD) slab (cols >= OUT_DIM are 0); store bf16.
    h3 = jnp.dot(h2.astype(jnp.bfloat16), w3_ref[...],
                 preferred_element_type=jnp.float32) + b3_ref[...]
    o_ref[...] = h3.astype(jnp.bfloat16)


def out_cnn_forward(x, params):
    """x: (B, SEQ_LEN, 200) f32; params in original (unpadded, f32) layout."""
    wc, bc, w1, b1, w2, b2, w3, b3 = params
    b_in, s, k_in = x.shape
    sk = s * k_in

    tile_b = _pick_tile_b(b_in)
    num_tiles = _cdiv(b_in, tile_b)
    b_pad = num_tiles * tile_b

    # Free metadata reshape (contiguous memory); batch pad only when actually needed.
    xf = x.reshape(b_in, sk)
    if b_pad != b_in:
        xf = jnp.pad(xf, ((0, b_pad - b_in), (0, 0)))

    # --- tiny host-side weight prep (weights only; no pass over x) -----------------------
    # Block-diagonal conv weight: wbd[t*K + p, t] = wc[p]; zero elsewhere.
    wbd = jnp.kron(jnp.eye(s, dtype=jnp.float32), wc.reshape(k_in, 1)).astype(jnp.bfloat16)
    bc2 = bc.reshape(1, 1).astype(jnp.float32)
    w1b = w1.astype(jnp.bfloat16)                                         # (SEQ_LEN, 512)
    b1f = b1.reshape(1, FC1).astype(jnp.float32)
    w2p = jnp.zeros((FC1, H_PAD), jnp.bfloat16).at[:, :H_DIM].set(w2.astype(jnp.bfloat16))
    b2p = jnp.zeros((1, H_PAD), jnp.float32).at[0, :H_DIM].set(b2.reshape(-1))
    w3p = jnp.zeros((H_PAD, OUT_PAD), jnp.bfloat16).at[:H_DIM, :OUT_DIM].set(
        w3.astype(jnp.bfloat16))
    b3p = jnp.zeros((1, OUT_PAD), jnp.float32).at[0, :OUT_DIM].set(b3.reshape(-1))

    operands = (xf, wbd, bc2, w1b, b1f, w2p, b2p, w3p, b3p)

    # Advisory cost estimate: this call is DMA/overhead bound, help XLA overlap it.
    flops = 2 * b_pad * (sk * s + s * FC1 + FC1 * H_PAD + H_PAD * OUT_PAD)
    bytes_accessed = sum(int(a.size) * a.dtype.itemsize for a in operands)
    bytes_accessed += b_pad * OUT_PAD * 2

    vmem = pl.BlockSpec(memory_space=pltpu.MemorySpace.VMEM)
    smem = pl.BlockSpec(memory_space=pltpu.MemorySpace.SMEM)

    out = pl.pallas_call(
        out_cnn_kernel,
        out_shape=jax.ShapeDtypeStruct((b_pad, OUT_PAD), jnp.bfloat16),
        grid=(num_tiles,),
        in_specs=[
            pl.BlockSpec((tile_b, sk), lambda i: (i, 0)),   # x: batch-tiled, full-extent lanes
            vmem,                                           # block-diag conv weight
            smem,                                           # conv bias (scalar path)
            vmem, vmem,                                     # w1, b1
            vmem, vmem,                                     # w2, b2
            vmem, vmem,                                     # w3, b3
        ],
        out_specs=pl.BlockSpec((tile_b, OUT_PAD), lambda i: (i, 0)),
        compiler_params=pltpu.CompilerParams(
            dimension_semantics=("parallel",)),             # megacore sharding on v7x
        cost_estimate=pl.CostEstimate(
            flops=flops, transcendentals=0, bytes_accessed=bytes_accessed),
    )(*operands)

    return out[:b_in, :OUT_DIM].astype(jnp.float32)


def make_params(key):
    ks = jax.random.split(key, 8)
    s = 0.05
    wc = s * jax.random.normal(ks[0], (1, 1, K), jnp.float32)       # conv weight (full width)
    bc = s * jax.random.normal(ks[1], (1, 1), jnp.float32)          # conv bias (scalar)
    w1 = s * jax.random.normal(ks[2], (SEQ_LEN, FC1), jnp.float32)  # fc weights in (in, out)
    b1 = s * jax.random.normal(ks[3], (1, FC1), jnp.float32)
    w2 = s * jax.random.normal(ks[4], (FC1, H_DIM), jnp.float32)
    b2 = s * jax.random.normal(ks[5], (1, H_DIM), jnp.float32)
    w3 = s * jax.random.normal(ks[6], (H_DIM, OUT_DIM), jnp.float32)
    b3 = s * jax.random.normal(ks[7], (1, OUT_DIM), jnp.float32)
    return (wc, bc, w1, b1, w2, b2, w3, b3)


def reference_forward(x, params):
    # Pure-JAX f32 reference mirroring the PyTorch forward exactly.
    wc, bc, w1, b1, w2, b2, w3, b3 = params
    conv = jnp.sum(x * wc, axis=-1) + bc                 # conv1 + flatten -> (B, SEQ_LEN)
    h0 = jax.nn.relu(conv)
    h1 = jax.nn.relu(h0 @ w1 + b1)                       # dropout(p=0) is identity
    h2 = jax.nn.relu(h1 @ w2 + b2)
    return h2 @ w3 + b3


if __name__ == "__main__":
    key = jax.random.PRNGKey(0)
    kx, kp = jax.random.split(key)
    x = jax.random.normal(kx, (B, SEQ_LEN, K), jnp.float32)
    params = make_params(kp)

    fwd = jax.jit(out_cnn_forward)
    out = jax.block_until_ready(fwd(x, params))

    ref = reference_forward(x, params)
    # Kernel computes in bf16 on the MXU (f32 accumulation) and stores bf16.
    np.testing.assert_allclose(np.asarray(out), np.asarray(ref), rtol=2e-2, atol=2e-2)

    print("KERNEL_OK")
</pallas_src>

<mosaic_0001>
module attributes {stable_mosaic.version = 11 : i64} {
  func.func @out_cnn_kernel(%arg0: i32, %arg1: memref<8x1600xf32, #tpu.memory_space<vmem>>, %arg2: memref<1600x8xbf16, #tpu.memory_space<vmem>>, %arg3: memref<1x1xf32, #tpu.memory_space<smem>>, %arg4: memref<8x512xbf16, #tpu.memory_space<vmem>>, %arg5: memref<1x512xf32, #tpu.memory_space<vmem>>, %arg6: memref<512x128xbf16, #tpu.memory_space<vmem>>, %arg7: memref<1x128xf32, #tpu.memory_space<vmem>>, %arg8: memref<128x128xbf16, #tpu.memory_space<vmem>>, %arg9: memref<1x128xf32, #tpu.memory_space<vmem>>, %arg10: memref<8x128xbf16, #tpu.memory_space<vmem>>) attributes {dimension_semantics = [#tpu.dimension_semantics<parallel>], iteration_bounds = array<i64: 1>, scalar_prefetch = 0 : i64, scratch_operands = 0 : i64, tpu.core_type = #tpu.core_type<tc>, window_params = [{transform_indices = @transform_0, window_bounds = array<i64: 8, 1600>}, {pipeline_mode = #tpu.pipeline_mode<synchronous>, transform_indices = @transform_1, window_bounds = array<i64: 1600, 8>}, {transform_indices = @transform_2, window_bounds = array<i64: 1, 1>}, {pipeline_mode = #tpu.pipeline_mode<synchronous>, transform_indices = @transform_3, window_bounds = array<i64: 8, 512>}, {pipeline_mode = #tpu.pipeline_mode<synchronous>, transform_indices = @transform_4, window_bounds = array<i64: 1, 512>}, {pipeline_mode = #tpu.pipeline_mode<synchronous>, transform_indices = @transform_5, window_bounds = array<i64: 512, 128>}, {pipeline_mode = #tpu.pipeline_mode<synchronous>, transform_indices = @transform_6, window_bounds = array<i64: 1, 128>}, {pipeline_mode = #tpu.pipeline_mode<synchronous>, transform_indices = @transform_7, window_bounds = array<i64: 128, 128>}, {pipeline_mode = #tpu.pipeline_mode<synchronous>, transform_indices = @transform_8, window_bounds = array<i64: 1, 128>}, {transform_indices = @transform_9, window_bounds = array<i64: 8, 128>}]} {
    %c0 = arith.constant 0 : index
    %c0_0 = arith.constant 0 : index
    %0 = vector.load %arg1[%c0, %c0_0] : memref<8x1600xf32, #tpu.memory_space<vmem>>, vector<8x1600xf32>
    %1 = arith.truncf %0 : vector<8x1600xf32> to vector<8x1600xbf16>
    %c0_1 = arith.constant 0 : index
    %c0_2 = arith.constant 0 : index
    %2 = vector.load %arg2[%c0_1, %c0_2] : memref<1600x8xbf16, #tpu.memory_space<vmem>>, vector<1600x8xbf16>
    %cst = arith.constant dense<0.000000e+00> : vector<8x8xf32>
    %3 = tpu.matmul %1, %2, %cst {dimension_numbers = #tpu.dot_dimension_numbers<[1], [0], [0], [1], [0, 0, 1, 1], [], []>} : vector<8x1600xbf16>, vector<1600x8xbf16>, vector<8x8xf32> -> vector<8x8xf32>
    %c0_3 = arith.constant 0 : index
    %c0_4 = arith.constant 0 : index
    %4 = memref.load %arg3[%c0_3, %c0_4] : memref<1x1xf32, #tpu.memory_space<smem>>
    %5 = vector.broadcast %4 : f32 to vector<8x8xf32>
    %6 = arith.addf %3, %5 : vector<8x8xf32>
    %cst_5 = arith.constant 0.000000e+00 : f32
    %7 = vector.broadcast %cst_5 : f32 to vector<8x8xf32>
    %8 = arith.maximumf %6, %7 : vector<8x8xf32>
    %9 = arith.truncf %8 : vector<8x8xf32> to vector<8x8xbf16>
    %c0_6 = arith.constant 0 : index
    %c0_7 = arith.constant 0 : index
    %10 = vector.load %arg4[%c0_6, %c0_7] : memref<8x512xbf16, #tpu.memory_space<vmem>>, vector<8x512xbf16>
    %cst_8 = arith.constant dense<0.000000e+00> : vector<8x512xf32>
    %11 = tpu.matmul %9, %10, %cst_8 {dimension_numbers = #tpu.dot_dimension_numbers<[1], [0], [0], [1], [0, 0, 1, 1], [], []>} : vector<8x8xbf16>, vector<8x512xbf16>, vector<8x512xf32> -> vector<8x512xf32>
    %c0_9 = arith.constant 0 : index
    %c0_10 = arith.constant 0 : index
    %12 = vector.load %arg5[%c0_9, %c0_10] : memref<1x512xf32, #tpu.memory_space<vmem>>, vector<1x512xf32>
    %13 = vector.broadcast %12 : vector<1x512xf32> to vector<8x512xf32>
    %14 = arith.addf %11, %13 : vector<8x512xf32>
    %cst_11 = arith.constant 0.000000e+00 : f32
    %15 = vector.broadcast %cst_11 : f32 to vector<8x512xf32>
    %16 = arith.maximumf %14, %15 : vector<8x512xf32>
    %17 = arith.truncf %16 : vector<8x512xf32> to vector<8x512xbf16>
    %c0_12 = arith.constant 0 : index
    %c0_13 = arith.constant 0 : index
    %18 = vector.load %arg6[%c0_12, %c0_13] : memref<512x128xbf16, #tpu.memory_space<vmem>>, vector<512x128xbf16>
    %cst_14 = arith.constant dense<0.000000e+00> : vector<8x128xf32>
    %19 = tpu.matmul %17, %18, %cst_14 {dimension_numbers = #tpu.dot_dimension_numbers<[1], [0], [0], [1], [0, 0, 1, 1], [], []>} : vector<8x512xbf16>, vector<512x128xbf16>, vector<8x128xf32> -> vector<8x128xf32>
    %c0_15 = arith.constant 0 : index
    %c0_16 = arith.constant 0 : index
    %20 = vector.load %arg7[%c0_15, %c0_16] : memref<1x128xf32, #tpu.memory_space<vmem>>, vector<1x128xf32>
    %21 = vector.broadcast %20 : vector<1x128xf32> to vector<8x128xf32>
    %22 = arith.addf %19, %21 : vector<8x128xf32>
    %cst_17 = arith.constant 0.000000e+00 : f32
    %23 = vector.broadcast %cst_17 : f32 to vector<8x128xf32>
    %24 = arith.maximumf %22, %23 : vector<8x128xf32>
    %25 = arith.truncf %24 : vector<8x128xf32> to vector<8x128xbf16>
    %c0_18 = arith.constant 0 : index
    %c0_19 = arith.constant 0 : index
    %26 = vector.load %arg8[%c0_18, %c0_19] : memref<128x128xbf16, #tpu.memory_space<vmem>>, vector<128x128xbf16>
    %cst_20 = arith.constant dense<0.000000e+00> : vector<8x128xf32>
    %27 = tpu.matmul %25, %26, %cst_20 {dimension_numbers = #tpu.dot_dimension_numbers<[1], [0], [0], [1], [0, 0, 1, 1], [], []>} : vector<8x128xbf16>, vector<128x128xbf16>, vector<8x128xf32> -> vector<8x128xf32>
    %c0_21 = arith.constant 0 : index
    %c0_22 = arith.constant 0 : index
    %28 = vector.load %arg9[%c0_21, %c0_22] : memref<1x128xf32, #tpu.memory_space<vmem>>, vector<1x128xf32>
    %29 = vector.broadcast %28 : vector<1x128xf32> to vector<8x128xf32>
    %30 = arith.addf %27, %29 : vector<8x128xf32>
    %31 = arith.truncf %30 : vector<8x128xf32> to vector<8x128xbf16>
    %c0_23 = arith.constant 0 : index
    %c0_24 = arith.constant 0 : index
    %32 = vector.load %arg10[%c0_23, %c0_24] : memref<8x128xbf16, #tpu.memory_space<vmem>>, vector<8x128xbf16>
    tpu.vector_store %arg10[%c0_23, %c0_24], %31 {strides = array<i32>} : memref<8x128xbf16, #tpu.memory_space<vmem>>, vector<8x128xbf16>,
    return
  }
  func.func @transform_0(%arg0: i32) -> (i32, i32) {
    %c0_i32 = arith.constant 0 : i32
    %c0_i32_0 = arith.constant 0 : i32
    return %arg0, %c0_i32 : i32, i32
  }
  func.func @transform_1(%arg0: i32) -> (i32, i32) {
    %c0_i32 = arith.constant 0 : i32
    %c0_i32_0 = arith.constant 0 : i32
    %c0_i32_1 = arith.constant 0 : i32
    return %c0_i32, %c0_i32_0 : i32, i32
  }
  func.func @transform_2(%arg0: i32) -> (i32, i32) {
    %c0_i32 = arith.constant 0 : i32
    %c0_i32_0 = arith.constant 0 : i32
    %c0_i32_1 = arith.constant 0 : i32
    return %c0_i32, %c0_i32_0 : i32, i32
  }
  func.func @transform_3(%arg0: i32) -> (i32, i32) {
    %c0_i32 = arith.constant 0 : i32
    %c0_i32_0 = arith.constant 0 : i32
    %c0_i32_1 = arith.constant 0 : i32
    return %c0_i32, %c0_i32_0 : i32, i32
  }
  func.func @transform_4(%arg0: i32) -> (i32, i32) {
    %c0_i32 = arith.constant 0 : i32
    %c0_i32_0 = arith.constant 0 : i32
    %c0_i32_1 = arith.constant 0 : i32
    return %c0_i32, %c0_i32_0 : i32, i32
  }
  func.func @transform_5(%arg0: i32) -> (i32, i32) {
    %c0_i32 = arith.constant 0 : i32
    %c0_i32_0 = arith.constant 0 : i32
    %c0_i32_1 = arith.constant 0 : i32
    return %c0_i32, %c0_i32_0 : i32, i32
  }
  func.func @transform_6(%arg0: i32) -> (i32, i32) {
    %c0_i32 = arith.constant 0 : i32
    %c0_i32_0 = arith.constant 0 : i32
    %c0_i32_1 = arith.constant 0 : i32
    return %c0_i32, %c0_i32_0 : i32, i32
  }
  func.func @transform_7(%arg0: i32) -> (i32, i32) {
    %c0_i32 = arith.constant 0 : i32
    %c0_i32_0 = arith.constant 0 : i32
    %c0_i32_1 = arith.constant 0 : i32
    return %c0_i32, %c0_i32_0 : i32, i32
  }
  func.func @transform_8(%arg0: i32) -> (i32, i32) {
    %c0_i32 = arith.constant 0 : i32
    %c0_i32_0 = arith.constant 0 : i32
    %c0_i32_1 = arith.constant 0 : i32
    return %c0_i32, %c0_i32_0 : i32, i32
  }
  func.func @transform_9(%arg0: i32) -> (i32, i32) {
    %c0_i32 = arith.constant 0 : i32
    %c0_i32_0 = arith.constant 0 : i32
    return %arg0, %c0_i32 : i32, i32
  }
}

</mosaic_0001>

<bundles_post_ra>
// kernel: out_cnn_forward.1
= control target key start
LH: loop header
LB: loop body
LE: loop exit
PB: predicated region body
PF: predicated region fallthrough
CT: control target
= control target key end

     0   :  { %vm2272_vm0 = vmmov 0   ;;  %vm862_vm1 = vcmask 523264   ;;  %vm1186_vm2 = vcmask 1043456   ;;  %vm1182_vm3 = vcmask 64512   ;;  %s2825_s1 = inlined_call_operand.vmem [shape: bf16[1600,8], index: 1, kind: input, shape index: {}]   ;;  %s2826_s0 = inlined_call_operand.vmem [shape: f32[8,1600], index: 0, kind: input, shape index: {}]   ;;  %s2827_s3 = inlined_call_operand.vmem [shape: bf16[8,512], index: 3, kind: input, shape index: {}]   ;;  %s2828_s5 = inlined_call_operand.vmem [shape: bf16[512,128], index: 5, kind: input, shape index: {}]   ;;  %s2829_s2 = inlined_call_operand.<no memory space> [shape: f32[1,1], index: 2, kind: input, shape index: {}]   ;;  %s2830_s7 = inlined_call_operand.vmem [shape: bf16[128,128], index: 7, kind: input, shape index: {}]   ;;  %s2831_s4 = inlined_call_operand.vmem [shape: f32[1,512], index: 4, kind: input, shape index: {}]   ;;  %s2832_s6 = inlined_call_operand.vmem [shape: f32[1,128], index: 6, kind: input, shape index: {}]   ;;  %s2833_s8 = inlined_call_operand.vmem [shape: f32[1,128], index: 8, kind: input, shape index: {}]   ;;  %s2834_s9 = inlined_call_operand.vmem [shape: bf16[8,128], index: 9, kind: output, shape index: {}]  }
   0x1   :  { %v2127_v0 = vld [vmem:[%s2825_s1 + $0x40] sm:$0xff]   ;;  %v2131_v4 = vld [vmem:[%s2825_s1 + $0x48] sm:$0xff]   ;;  %v2135_v8 = vld [vmem:[%s2825_s1 + $0x50] sm:$0xff]  }
   0x2   :  { %v2128_v1 = vld [vmem:[%s2825_s1 + $0xc0] sm:$0xff]   ;;  %1902 = vmatprep.subr.bf16.mxu0 %v2127_v0  ;;  %v2132_v5 = vld [vmem:[%s2825_s1 + $0xc8] sm:$0xff]   ;;  %v2136_v9 = vld [vmem:[%s2825_s1 + $0xd0] sm:$0xff]  }
   0x3   :  { %v2129_v2 = vld [vmem:[%s2825_s1] sm:$0xff]   ;;  %1924 = vmatprep.subr.bf16.mxu1 %v2128_v1  ;;  %v2133_v6 = vld [vmem:[%s2825_s1 + $0x8] sm:$0xff]   ;;  %v2137_v10 = vld [vmem:[%s2825_s1 + $0x10] sm:$0xff]  }
   0x4   :  { %v2130_v3 = vld [vmem:[%s2825_s1 + $0x80] sm:$0xff]   ;;  %1903 = vmatpush3.bf16.msra.mxu0 %v2129_v2  ;;  %v2134_v7 = vld [vmem:[%s2825_s1 + $0x88] sm:$0xff]   ;;  %v2138_v11 = vld [vmem:[%s2825_s1 + $0x90] sm:$0xff]  }
   0x5   :  { %1925 = vmatpush3.bf16.msra.mxu1 %v2130_v3  ;;  %1904 = vmatprep.subr.bf16.mxu0 %v2131_v4  ;;  %v2139_v12 = vld [vmem:[%s2825_s1 + $0x58] sm:$0xff]   ;;  %v2143_v16 = vld [vmem:[%s2825_s1 + $0x60] sm:$0xff]   ;;  %v2147_v20 = vld [vmem:[%s2825_s1 + $0x68] sm:$0xff]  }
   0x6   :  { %1926 = vmatprep.subr.bf16.mxu1 %v2132_v5  ;;  %v2140_v13 = vld [vmem:[%s2825_s1 + $0xd8] sm:$0xff]   ;;  %v2144_v17 = vld [vmem:[%s2825_s1 + $0xe0] sm:$0xff]   ;;  %v2148_v21 = vld [vmem:[%s2825_s1 + $0xe8] sm:$0xff]  }
   0x7   :  { %v2141_v14 = vld [vmem:[%s2825_s1 + $0x18] sm:$0xff]   ;;  %v2145_v18 = vld [vmem:[%s2825_s1 + $0x20] sm:$0xff]   ;;  %v2149_v22 = vld [vmem:[%s2825_s1 + $0x28] sm:$0xff]  }
   0x8   :  { %1905 = vmatpush3.bf16.msra.mxu0 %v2133_v6  ;;  %v2142_v15 = vld [vmem:[%s2825_s1 + $0x98] sm:$0xff]   ;;  %v2146_v19 = vld [vmem:[%s2825_s1 + $0xa0] sm:$0xff]   ;;  %v2150_v23 = vld [vmem:[%s2825_s1 + $0xa8] sm:$0xff]  }
   0x9   :  { %1927 = vmatpush3.bf16.msra.mxu1 %v2134_v7  ;;  %1906 = vmatprep.subr.bf16.mxu0 %v2135_v8  ;;  %v2151_v24 = vld [vmem:[%s2825_s1 + $0x70] sm:$0xff]   ;;  %v2155_v28 = vld [vmem:[%s2825_s1 + $0x78] sm:$0xff]   ;;  %v35_v32 = vld [vmem:[%s2826_s0 + $0x8] sm:$0xff] }
   0xa   :  { %1928 = vmatprep.subr.bf16.mxu1 %v2136_v9  ;;  %v2152_v25 = vld [vmem:[%s2825_s1 + $0xf0] sm:$0xff]   ;;  %v2156_v29 = vld [vmem:[%s2825_s1 + $0xf8] sm:$0xff]   ;;  %v34_v34 = vld [vmem:[%s2826_s0] sm:$0xff]  ;;  %v48_v35 = vpack.c.bf16 %v35_v32, %v35_v32 }
   0xb   :  { %v2153_v26 = vld [vmem:[%s2825_s1 + $0x30] sm:$0xff]   ;;  %v2157_v30 = vld [vmem:[%s2825_s1 + $0x38] sm:$0xff]   ;;  %v47_v37 = vpack.c.bf16 %v34_v34, %v34_v34  ;;  %v2159_v40 = vld [vmem:[%s2825_s1 + $0x140] sm:$0xff]  }
   0xc   :  { %1907 = vmatpush3.bf16.msra.mxu0 %v2137_v10  ;;  %v2154_v27 = vld [vmem:[%s2825_s1 + $0xb0] sm:$0xff]   ;;  %v2158_v31 = vld [vmem:[%s2825_s1 + $0xb8] sm:$0xff]   ;;  %898 = vmatprep.mubr.bf16.mxu0 %v48_v35  ;;  %v2160_v41 = vld [vmem:[%s2825_s1 + $0x1c0] sm:$0xff]  }
   0xd   :  { %1929 = vmatpush3.bf16.msra.mxu1 %v2138_v11  ;;  %1908 = vmatprep.subr.bf16.mxu0 %v2139_v12  ;;  %v37_v33 = vld [vmem:[%s2826_s0 + $0x18] sm:$0xff]  ;;  %v36_v38 = vld [vmem:[%s2826_s0 + $0x10] sm:$0xff]  ;;  %v2161_v42 = vld [vmem:[%s2825_s1 + $0x100] sm:$0xff]  }
   0xe   :  { %1930 = vmatprep.subr.bf16.mxu1 %v2140_v13  ;;  %v50_v36 = vpack.c.bf16 %v37_v33, %v37_v33  ;;  %v49_v39 = vpack.c.bf16 %v36_v38, %v36_v38  ;;  %v2162_v43 = vld [vmem:[%s2825_s1 + $0x180] sm:$0xff]   ;;  %v2163_v44 = vld [vmem:[%s2825_s1 + $0x148] sm:$0xff]   ;;  %v2167_v48 = vld [vmem:[%s2825_s1 + $0x150] sm:$0xff]  }
   0xf   :  { %v2164_v45 = vld [vmem:[%s2825_s1 + $0x1c8] sm:$0xff]   ;;  %v2168_v49 = vld [vmem:[%s2825_s1 + $0x1d0] sm:$0xff]   ;;  %v2171_v52 = vld [vmem:[%s2825_s1 + $0x158] sm:$0xff]  }
  0x10   :  { %1909 = vmatpush3.bf16.msra.mxu0 %v2141_v14  ;;  %938 = vmatprep.mubr.bf16.mxu1 %v50_v36  ;;  %v2165_v46 = vld [vmem:[%s2825_s1 + $0x108] sm:$0xff]   ;;  %v2169_v50 = vld [vmem:[%s2825_s1 + $0x110] sm:$0xff]   ;;  %v2172_v53 = vld [vmem:[%s2825_s1 + $0x1d8] sm:$0xff]  }
  0x11   :  { %1931 = vmatpush3.bf16.msra.mxu1 %v2142_v15  ;;  %1910 = vmatprep.subr.bf16.mxu0 %v2143_v16  ;;  %v2166_v47 = vld [vmem:[%s2825_s1 + $0x188] sm:$0xff]   ;;  %v2170_v51 = vld [vmem:[%s2825_s1 + $0x190] sm:$0xff]   ;;  %v2173_v54 = vld [vmem:[%s2825_s1 + $0x118] sm:$0xff]  }
  0x12   :  { %1932 = vmatprep.subr.bf16.mxu1 %v2144_v17  ;;  %v2174_v55 = vld [vmem:[%s2825_s1 + $0x198] sm:$0xff]   ;;  %v2175_v56 = vld [vmem:[%s2825_s1 + $0x160] sm:$0xff]   ;;  %v2179_v60 = vld [vmem:[%s2825_s1 + $0x168] sm:$0xff]  }
  0x13   :  { %v2176_v57 = vld [vmem:[%s2825_s1 + $0x1e0] sm:$0xff]   ;;  %v2180_v61 = vld [vmem:[%s2825_s1 + $0x1e8] sm:$0xff]   ;;  %v2183_v0 = vld [vmem:[%s2825_s1 + $0x170] sm:$0xff]  }
  0x14   :  { %1911 = vmatpush3.bf16.msra.mxu0 %v2145_v18  ;;  %v2177_v58 = vld [vmem:[%s2825_s1 + $0x120] sm:$0xff]   ;;  %v2181_v62 = vld [vmem:[%s2825_s1 + $0x128] sm:$0xff]   ;;  %v2184_v1 = vld [vmem:[%s2825_s1 + $0x1f0] sm:$0xff]  }
  0x15   :  { %1933 = vmatpush3.bf16.msra.mxu1 %v2146_v19  ;;  %1912 = vmatprep.subr.bf16.mxu0 %v2147_v20  ;;  %v2178_v59 = vld [vmem:[%s2825_s1 + $0x1a0] sm:$0xff]   ;;  %v2182_v63 = vld [vmem:[%s2825_s1 + $0x1a8] sm:$0xff]   ;;  %v2185_v2 = vld [vmem:[%s2825_s1 + $0x130] sm:$0xff]  }
  0x16   :  { %1934 = vmatprep.subr.bf16.mxu1 %v2148_v21  ;;  %v2186_v3 = vld [vmem:[%s2825_s1 + $0x1b0] sm:$0xff]   ;;  %v2187_v4 = vld [vmem:[%s2825_s1 + $0x178] sm:$0xff]   ;;  %v39_v8 = vld [vmem:[%s2826_s0 + $0x28] sm:$0xff] }
  0x17   :  { %v2188_v5 = vld [vmem:[%s2825_s1 + $0x1f8] sm:$0xff]   ;;  %v52_v10 = vpack.c.bf16 %v39_v8, %v39_v8  ;;  %v38_v12 = vld [vmem:[%s2826_s0 + $0x20] sm:$0xff]  ;;  %v40_v13 = vld [vmem:[%s2826_s0 + $0x30] sm:$0xff] }
  0x18   :  { %1913 = vmatpush3.bf16.msra.mxu0 %v2149_v22  ;;  %v2189_v6 = vld [vmem:[%s2825_s1 + $0x138] sm:$0xff]   ;;  %v51_v14 = vpack.c.bf16 %v38_v12, %v38_v12  ;;  %v53_v15 = vpack.c.bf16 %v40_v13, %v40_v13  ;;  %v2191_v16 = vld [vmem:[%s2825_s1 + $0x240] sm:$0xff]   ;;  %v2195_v20 = vld [vmem:[%s2825_s1 + $0x248] sm:$0xff]  }
  0x19   :  { %1935 = vmatpush3.bf16.msra.mxu1 %v2150_v23  ;;  %1914 = vmatprep.subr.bf16.mxu0 %v2151_v24  ;;  %v2190_v7 = vld [vmem:[%s2825_s1 + $0x1b8] sm:$0xff]   ;;  %v2192_v17 = vld [vmem:[%s2825_s1 + $0x2c0] sm:$0xff]   ;;  %v2196_v21 = vld [vmem:[%s2825_s1 + $0x2c8] sm:$0xff]  }
  0x1a   :  { %1936 = vmatprep.subr.bf16.mxu1 %v2152_v25  ;;  %v41_v9 = vld [vmem:[%s2826_s0 + $0x38] sm:$0xff]  ;;  %v2193_v18 = vld [vmem:[%s2825_s1 + $0x200] sm:$0xff]   ;;  %v2197_v22 = vld [vmem:[%s2825_s1 + $0x208] sm:$0xff]  }
  0x1b   :  { %v54_v11 = vpack.c.bf16 %v41_v9, %v41_v9  ;;  %v2194_v19 = vld [vmem:[%s2825_s1 + $0x280] sm:$0xff]   ;;  %v2198_v23 = vld [vmem:[%s2825_s1 + $0x288] sm:$0xff]   ;;  %v2199_v24 = vld [vmem:[%s2825_s1 + $0x250] sm:$0xff]  }
  0x1c   :  { %1915 = vmatpush3.bf16.msra.mxu0 %v2153_v26  ;;  %v2200_v25 = vld [vmem:[%s2825_s1 + $0x2d0] sm:$0xff]   ;;  %v2207_v32 = vld [vmem:[%s2825_s1 + $0x260] sm:$0xff]   ;;  %v2211_v36 = vld [vmem:[%s2825_s1 + $0x268] sm:$0xff]  }
  0x1d   :  { %1937 = vmatpush3.bf16.msra.mxu1 %v2154_v27  ;;  %1916 = vmatprep.subr.bf16.mxu0 %v2155_v28  ;;  %v2201_v26 = vld [vmem:[%s2825_s1 + $0x210] sm:$0xff]   ;;  %v2203_v28 = vld [vmem:[%s2825_s1 + $0x258] sm:$0xff]   ;;  %v2208_v33 = vld [vmem:[%s2825_s1 + $0x2e0] sm:$0xff]  }
  0x1e   :  { %1938 = vmatprep.subr.bf16.mxu1 %v2156_v29  ;;  %v2202_v27 = vld [vmem:[%s2825_s1 + $0x290] sm:$0xff]   ;;  %v2204_v29 = vld [vmem:[%s2825_s1 + $0x2d8] sm:$0xff]   ;;  %v2209_v34 = vld [vmem:[%s2825_s1 + $0x220] sm:$0xff]  }
  0x1f   :  { %v2210_v35 = vld [vmem:[%s2825_s1 + $0x2a0] sm:$0xff]   ;;  %v2213_v38 = vld [vmem:[%s2825_s1 + $0x228] sm:$0xff]   ;;  %v2235_v12 = vld [vmem:[%s2828_s5 + $0x50] sm:$0xff]  }
  0x20   :  { %1917 = vmatpush3.bf16.msra.mxu0 %v2157_v30  ;;  %v2205_v30 = vld [vmem:[%s2825_s1 + $0x218] sm:$0xff]   ;;  %v2231_v8 = vld [vmem:[%s2828_s5 + $0x40] sm:$0xff]   ;;  %v2237_v13 = vld [vmem:[%s2828_s5 + $0x10] sm:$0xff]  }
  0x21   :  { %1939 = vmatpush3.bf16.msra.mxu1 %v2158_v31  ;;  %1946 = vmatprep.subr.bf16.mxu0 %v2159_v40  ;;  %v2206_v31 = vld [vmem:[%s2825_s1 + $0x298] sm:$0xff]   ;;  %v2215_v40 = vld [vmem:[%s2825_s1 + $0x270] sm:$0xff]   ;;  %v2232_v9 = vld [vmem:[%s2828_s5] sm:$0xff]  }
  0x22   :  { %1968 = vmatprep.subr.bf16.mxu1 %v2160_v41  ;;  %v2216_v41 = vld [vmem:[%s2825_s1 + $0x2f0] sm:$0xff]  }
  0x23   :  { %899 = vmatmul.mubr.bf16.vlgmr.msra.gmra.mrb[0].mxu0 %v47_v37  ;;  %v2212_v37 = vld [vmem:[%s2825_s1 + $0x2e8] sm:$0xff]  }
  0x24   :  { %939 = vmatmul.mubr.bf16.vlgmr.msra.gmra.mrb[0].mxu1 %v49_v39  ;;  %1947 = vmatpush3.bf16.msra.mxu0 %v2161_v42  ;;  %v2214_v39 = vld [vmem:[%s2825_s1 + $0x2a8] sm:$0xff]   ;;  %v2217_v42 = vld [vmem:[%s2825_s1 + $0x230] sm:$0xff]  }
  0x25   :  { %1969 = vmatpush3.bf16.msra.mxu1 %v2162_v43  ;;  %1948 = vmatprep.subr.bf16.mxu0 %v2163_v44  ;;  %v2218_v43 = vld [vmem:[%s2825_s1 + $0x2b0] sm:$0xff]   ;;  %v2219_v44 = vld [vmem:[%s2825_s1 + $0x278] sm:$0xff]  }
  0x26   :  { %1970 = vmatprep.subr.bf16.mxu1 %v2164_v45  ;;  %978 = vmatprep.mubr.bf16.mxu0 %v52_v10  ;;  %v2220_v45 = vld [vmem:[%s2825_s1 + $0x2f8] sm:$0xff]   ;;  %v2233_v10 = vld [vmem:[%s2828_s5 + $0x48] sm:$0xff]  }
  0x27   :  { %1018 = vmatprep.mubr.bf16.mxu1 %v54_v11  ;;  %v2234_v11 = vld [vmem:[%s2828_s5 + $0x8] sm:$0xff]  }
  0x28   :  { %1949 = vmatpush3.bf16.msra.mxu0 %v2165_v46  ;;  %v2221_v46 = vld [vmem:[%s2825_s1 + $0x238] sm:$0xff]  }
  0x29   :  { %1971 = vmatpush3.bf16.msra.mxu1 %v2166_v47  ;;  %1950 = vmatprep.subr.bf16.mxu0 %v2167_v48  ;;  %v2222_v47 = vld [vmem:[%s2825_s1 + $0x2b8] sm:$0xff]   ;;  %v43_v48 = vld [vmem:[%s2826_s0 + $0x48] sm:$0xff] }
  0x2a   :  { %1972 = vmatprep.subr.bf16.mxu1 %v2168_v49  ;;  %v56_v49 = vpack.c.bf16 %v43_v48, %v43_v48 }
  0x2c   :  { %1951 = vmatpush3.bf16.msra.mxu0 %v2169_v50  ;;  %v45_v50 = vld [vmem:[%s2826_s0 + $0x58] sm:$0xff] }
  0x2d   :  { %1973 = vmatpush3.bf16.msra.mxu1 %v2170_v51  ;;  %1952 = vmatprep.subr.bf16.mxu0 %v2171_v52  ;;  %v42_v51 = vld [vmem:[%s2826_s0 + $0x40] sm:$0xff]  ;;  %v44_v52 = vld [vmem:[%s2826_s0 + $0x50] sm:$0xff] }
  0x2e   :  { %1974 = vmatprep.subr.bf16.mxu1 %v2172_v53  ;;  %v58_v53 = vpack.c.bf16 %v45_v50, %v45_v50 }
  0x30   :  { %1953 = vmatpush3.bf16.msra.mxu0 %v2173_v54  ;;  %v55_v54 = vpack.c.bf16 %v42_v51, %v42_v51 }
  0x31   :  { %1975 = vmatpush3.bf16.msra.mxu1 %v2174_v55  ;;  %1954 = vmatprep.subr.bf16.mxu0 %v2175_v56  ;;  %v57_v55 = vpack.c.bf16 %v44_v52, %v44_v52  ;;  %v2223_v56 = vld [vmem:[%s2825_s1 + $0x300] sm:$0xff]  }
  0x32   :  { %1976 = vmatprep.subr.bf16.mxu1 %v2176_v57  ;;  %v2271_v57 = vmov 0.0  }
  0x34   :  { %1955 = vmatpush3.bf16.msra.mxu0 %v2177_v58  ;;  %v2224_v58 = vld [vmem:[%s2825_s1 + $0x308] sm:$0xff]  }
  0x35   :  { %1977 = vmatpush3.bf16.msra.mxu1 %v2178_v59  ;;  %1956 = vmatprep.subr.bf16.mxu0 %v2179_v60  ;;  %v2225_v59 = vld [vmem:[%s2825_s1 + $0x310] sm:$0xff]   ;;  %v2226_v60 = vld [vmem:[%s2825_s1 + $0x318] sm:$0xff]  }
  0x36   :  { %1978 = vmatprep.subr.bf16.mxu1 %v2180_v61  ;;  %v46_v61 = vld [vmem:[%s2826_s0 + $0x60] sm:$0xff] }
  0x38   :  { %1957 = vmatpush3.bf16.msra.mxu0 %v2181_v62  ;;  %v59_v62 = vpack.c.bf16 %v46_v61, %v46_v61 }
  0x39   :  { %1979 = vmatpush3.bf16.msra.mxu1 %v2182_v63  ;;  %1958 = vmatprep.subr.bf16.mxu0 %v2183_v0  ;;  %v1148_v63 = vld [vmem:[%s2827_s3] sm:$0xff] }
  0x3a   :  { %1980 = vmatprep.subr.bf16.mxu1 %v2184_v1  ;;  %v1853_v0 = vcombine.high %v1148_v63, %v1148_v63  ;;  %v1852_v1 = vcombine.low %v1148_v63, %v1148_v63 }
  0x3c   :  { %1959 = vmatpush3.bf16.msra.mxu0 %v2185_v2  ;;  %v1188_v2 = vsel %vm1186_vm2, %v1852_v1, 0  ;;  %v2236_v1 = vld [vmem:[%s2828_s5 + $0xc0] sm:$0xff]  }
  0x3d   :  { %1981 = vmatpush3.bf16.msra.mxu1 %v2186_v3  ;;  %1960 = vmatprep.subr.bf16.mxu0 %v2187_v4  ;;  %v1149_v3 = vld [vmem:[%s2827_s3 + $0x8] sm:$0xff]  ;;  %v2273_v4 = vmov 0  }
  0x3e   :  { %1982 = vmatprep.subr.bf16.mxu1 %v2188_v5  ;;  %v1855_v5 = vcombine.high %v1149_v3, %v1149_v3 }
  0x40   :  { %1961 = vmatpush3.bf16.msra.mxu0 %v2189_v6  ;;  %v1854_v6 = vcombine.low %v1149_v3, %v1149_v3  ;;  %v2240_v3 = vld [vmem:[%s2828_s5 + $0xc8] sm:$0xff]  }
  0x41   :  { %1983 = vmatpush3.bf16.msra.mxu1 %v2190_v7  ;;  %1990 = vmatprep.subr.bf16.mxu0 %v2191_v16  ;;  %v2243_v16 = vld [vmem:[%s2828_s5 + $0x60] sm:$0xff]  }
  0x42   :  { %2012 = vmatprep.subr.bf16.mxu1 %v2192_v17  ;;  %v2676_v7 = vsel %vm1186_vm2, %v1854_v6, 0  ;;  %v2245_v17 = vld [vmem:[%s2828_s5 + $0x20] sm:$0xff]   ;;  %v2246_v6 = vld [vmem:[%s2828_s5 + $0x90] sm:$0xff]  }
  0x43   :  { %979 = vmatmul.mubr.bf16.vlgmr.msra.gmra.mrb[4].mxu0 %v51_v14  ;;  %v2239_v14 = vld [vmem:[%s2828_s5 + $0x58] sm:$0xff]  }
  0x44   :  { %1019 = vmatmul.mubr.bf16.vlgmr.msra.gmra.mrb[4].mxu1 %v53_v15  ;;  %1991 = vmatpush3.bf16.msra.mxu0 %v2193_v18  ;;  %v2241_v15 = vld [vmem:[%s2828_s5 + $0x18] sm:$0xff]   ;;  %v2247_v18 = vld [vmem:[%s2828_s5 + $0x68] sm:$0xff]  }
  0x45   :  { %2013 = vmatpush3.bf16.msra.mxu1 %v2194_v19  ;;  %1992 = vmatprep.subr.bf16.mxu0 %v2195_v20  ;;  %v2249_v19 = vld [vmem:[%s2828_s5 + $0x28] sm:$0xff]  }
  0x46   :  { %2014 = vmatprep.subr.bf16.mxu1 %v2196_v21  ;;  %1058 = vmatprep.mubr.bf16.mxu0 %v56_v49 }
  0x47   :  { %1098 = vmatprep.mubr.bf16.mxu1 %v58_v53 }
  0x48   :  { %1993 = vmatpush3.bf16.msra.mxu0 %v2197_v22  ;;  %v261_v22 = vstv %s2829_s2 }
  0x49   :  { %2015 = vmatpush3.bf16.msra.mxu1 %v2198_v23  ;;  %1994 = vmatprep.subr.bf16.mxu0 %v2199_v24 }
  0x4a   :  { %2016 = vmatprep.subr.bf16.mxu1 %v2200_v25 }
  0x4c   :  { %1995 = vmatpush3.bf16.msra.mxu0 %v2201_v26 }
  0x4d   :  { %2017 = vmatpush3.bf16.msra.mxu1 %v2202_v27  ;;  %1996 = vmatprep.subr.bf16.mxu0 %v2203_v28 }
  0x4e   :  { %2018 = vmatprep.subr.bf16.mxu1 %v2204_v29 }
  0x50   :  { %1997 = vmatpush3.bf16.msra.mxu0 %v2205_v30 }
  0x51   :  { %2019 = vmatpush3.bf16.msra.mxu1 %v2206_v31  ;;  %1998 = vmatprep.subr.bf16.mxu0 %v2207_v32 }
  0x52   :  { %2020 = vmatprep.subr.bf16.mxu1 %v2208_v33 }
  0x54   :  { %1999 = vmatpush3.bf16.msra.mxu0 %v2209_v34 }
  0x55   :  { %2021 = vmatpush3.bf16.msra.mxu1 %v2210_v35  ;;  %2000 = vmatprep.subr.bf16.mxu0 %v2211_v36 }
  0x56   :  { %2022 = vmatprep.subr.bf16.mxu1 %v2212_v37 }
  0x58   :  { %2001 = vmatpush3.bf16.msra.mxu0 %v2213_v38 }
  0x59   :  { %2023 = vmatpush3.bf16.msra.mxu1 %v2214_v39  ;;  %2002 = vmatprep.subr.bf16.mxu0 %v2215_v40 }
  0x5a   :  { %2024 = vmatprep.subr.bf16.mxu1 %v2216_v41 }
  0x5c   :  { %2003 = vmatpush3.bf16.msra.mxu0 %v2217_v42 }
  0x5d   :  { %2025 = vmatpush3.bf16.msra.mxu1 %v2218_v43  ;;  %2004 = vmatprep.subr.bf16.mxu0 %v2219_v44 }
  0x5e   :  { %2026 = vmatprep.subr.bf16.mxu1 %v2220_v45 }
  0x60   :  { %2005 = vmatpush3.bf16.msra.mxu0 %v2221_v46 }
  0x61   :  { %2027 = vmatpush3.bf16.msra.mxu1 %v2222_v47  ;;  %2039 = vmatprep.subr.bf16.mxu0 %v2231_v8  ;;  %v2250_v8 = vld [vmem:[%s2828_s5 + $0x98] sm:$0xff]  }
  0x62   :  { %2092 = vmatprep.subr.bf16.mxu1 %v2271_v57 }
  0x63   :  { %1059 = vmatmul.mubr.bf16.vlgmr.msra.gmra.mrb[8].mxu0 %v55_v54 }
  0x64   :  { %1099 = vmatmul.mubr.bf16.vlgmr.msra.gmra.mrb[8].mxu1 %v57_v55  ;;  %2040 = vmatpush3.bf16.msra.mxu0 %v2232_v9  ;;  %v2251_v9 = vld [vmem:[%s2828_s5 + $0x70] sm:$0xff]  }
  0x65   :  { %2093 = vmatpush3.bf16.msra.mxu1 %v2223_v56  ;;  %2100 = vmatprep.mubr.msk.bf16.mxu1 %vm2272_vm0, %v2271_v57 }
  0x66   :  { %2094 = vmatprep.subr.bf16.mxu1 %v2271_v57  ;;  %2041 = vmatprep.subr.bf16.mxu0 %v2233_v10  ;;  %v2252_v10 = vld [vmem:[%s2828_s5 + $0xe0] sm:$0xff]  }
  0x68   :  { %2042 = vmatpush3.bf16.msra.mxu0 %v2234_v11  ;;  %v2253_v11 = vld [vmem:[%s2828_s5 + $0x30] sm:$0xff]  }
  0x69   :  { %2095 = vmatpush3.bf16.msra.mxu1 %v2224_v58  ;;  %2043 = vmatprep.subr.bf16.mxu0 %v2235_v12  ;;  %v2254_v12 = vld [vmem:[%s2828_s5 + $0xa0] sm:$0xff]  }
  0x6a   :  { %2096 = vmatprep.subr.bf16.mxu1 %v2271_v57 }
  0x6c   :  { %2044 = vmatpush3.bf16.msra.mxu0 %v2237_v13  ;;  %v2255_v13 = vld [vmem:[%s2828_s5 + $0x78] sm:$0xff]  }
  0x6d   :  { %2097 = vmatpush3.bf16.msra.mxu1 %v2225_v59  ;;  %2045 = vmatprep.subr.bf16.mxu0 %v2239_v14  ;;  %v2256_v14 = vld [vmem:[%s2828_s5 + $0xe8] sm:$0xff]  }
  0x6e   :  { %2098 = vmatprep.subr.bf16.mxu1 %v2271_v57 }
  0x70   :  { %2046 = vmatpush3.bf16.msra.mxu0 %v2241_v15  ;;  %v2257_v15 = vld [vmem:[%s2828_s5 + $0x38] sm:$0xff]  }
  0x71   :  { %2099 = vmatpush3.bf16.msra.mxu1 %v2226_v60  ;;  %2047 = vmatprep.subr.bf16.mxu0 %v2243_v16  ;;  %v2258_v16 = vld [vmem:[%s2828_s5 + $0xa8] sm:$0xff]  }
  0x72   :  { %1856 = vmatprep.subr.msk.bf16.mxu1 %vm1186_vm2, %v1853_v0 }
  0x74   :  { %2101 = vmatmul.mubr.msk.bf16.vlgmr.msra.gmra.mrb[12].mxu1 %vm862_vm1, %v59_v62  ;;  %2048 = vmatpush3.bf16.msra.mxu0 %v2245_v17  ;;  %v2259_v17 = vld [vmem:[%s2828_s5 + $0xf0] sm:$0xff]  }
  0x75   :  { %1200 = vmatpush1.bf16.msra.mxu1 %v1188_v2  ;;  %1231 = vmatprep.mubr.bf16.mxu1 %v2273_v4  ;;  %v2238_v2 = vld [vmem:[%s2828_s5 + $0x80] sm:$0xff]  }
  0x76   :  { %1858 = vmatprep.subr.msk.bf16.mxu1 %vm1186_vm2, %v1855_v5  ;;  %2049 = vmatprep.subr.bf16.mxu0 %v2247_v18  ;;  %v2242_v5 = vld [vmem:[%s2828_s5 + $0x88] sm:$0xff]   ;;  %v2260_v18 = vld [vmem:[%s2828_s5 + $0xb0] sm:$0xff]  }
  0x78   :  { %2050 = vmatpush3.bf16.msra.mxu0 %v2249_v19  ;;  %v2261_v19 = vld [vmem:[%s2828_s5 + $0xf8] sm:$0xff]  }
  0x79   :  { %2051 = vmatprep.subr.bf16.mxu0 %v2251_v9 }
  0x7c   :  { %2052 = vmatpush3.bf16.msra.mxu0 %v2253_v11  ;;  %v1893_v11 = vld [vmem:[%s2833_s8] ss:$0 sm:$0xff] }
  0x7d   :  { %2053 = vmatprep.subr.bf16.mxu0 %v2255_v13 }
  0x80   :  { %2054 = vmatpush3.bf16.msra.mxu0 %v2257_v15 }
  0x81   :  { %2104 = vmatprep.subr.bf16.mxu0 %v2271_v57 }
  0xf6   :  { %v1918_v20 = vpop.f32.mrb[0].mxu0 }
  0xf7   :  { %v1940_v21 = vpop.f32.mrb[0].mxu1  ;;  %v1919_v23 = vpop.f32.mrb[1].mxu0 }
  0xf8   :  { %v1941_v24 = vpop.f32.mrb[1].mxu1  ;;  %v1920_v25 = vadd.f32 %v1919_v23, %v1918_v20  ;;  %v1921_v28 = vpop.f32.mrb[2].mxu0  ;;  %v2262_v20 = vld [vmem:[%s2828_s5 + $0xb8] sm:$0xff]  }
  0xf9   :  { %v1942_v26 = vadd.f32 %v1941_v24, %v1940_v21  ;;  %v1943_v27 = vpop.f32.mrb[2].mxu1  ;;  %v1922_v30 = vpop.f32.mrb[3].mxu0  ;;  %v1152_v21 = vlaneseq  ;;  %v1150_v24 = vld [vmem:[%s2831_s4] sm:$0xf] }
  0xfa   :  { %v1944_v29 = vpop.f32.mrb[3].mxu1  ;;  %v901_v31 = vadd.f32 %v1920_v25, %v261_v22 }
  0xfb   :  { %v1153_v22 = vshrl.u32 %v1152_v21, 7 }
  0xfc   :  { %v941_v32 = vadd.f32 %v1942_v26, %v901_v31 }
  0xfd   :  { %v1154_v23 = vsub.s32 0, %v1153_v22  ;;  %v1158_v25 = vsub.s32 1, %v1153_v22  ;;  %v1162_v31 = vsub.s32 2, %v1153_v22 }
  0xff   :  { %v1155_v26 = vrot.slane %v1150_v24, %v1154_v23  ;;  %v1159_v27 = vrot.slane %v1150_v24, %v1158_v25 }
 0x116   :  { %v1962_v33 = vpop.f32.mrb[4].mxu0 }
 0x117   :  { %v1984_v34 = vpop.f32.mrb[4].mxu1  ;;  %v1963_v35 = vpop.f32.mrb[5].mxu0 }
 0x118   :  { %v1964_v36 = vadd.f32 %v1963_v35, %v1962_v33  ;;  %v1985_v37 = vpop.f32.mrb[5].mxu1  ;;  %v1965_v38 = vpop.f32.mrb[6].mxu0 }
 0x119   :  { %v1986_v39 = vadd.f32 %v1985_v37, %v1984_v34  ;;  %v1987_v40 = vpop.f32.mrb[6].mxu1  ;;  %v1966_v41 = vpop.f32.mrb[7].mxu0  ;;  %v1166_v34 = vsub.s32 3, %v1153_v22  ;;  %v1163_v38 = vrot.slane %v1150_v24, %v1162_v31 }
 0x11a   :  { %v981_v42 = vadd.f32 %v1964_v36, %v941_v32  ;;  %v1988_v43 = vpop.f32.mrb[7].mxu1  ;;  %v2263_v41 = vld [vmem:[%s2830_s7] sm:$0xff]  }
 0x11b   :  { %v1167_v40 = vrot.slane %v1150_v24, %v1166_v34 }
 0x11c   :  { %v1021_v44 = vadd.f32 %v1986_v39, %v981_v42 }
 0x136   :  { %v2006_v45 = vpop.f32.mrb[8].mxu0 }
 0x137   :  { %v2028_v46 = vpop.f32.mrb[8].mxu1  ;;  %v2007_v47 = vpop.f32.mrb[9].mxu0 }
 0x138   :  { %v2008_v48 = vadd.f32 %v2007_v47, %v2006_v45  ;;  %v2029_v49 = vpop.f32.mrb[9].mxu1  ;;  %v2009_v50 = vpop.f32.mrb[10].mxu0 }
 0x139   :  { %v2030_v51 = vadd.f32 %v2029_v49, %v2028_v46  ;;  %v2031_v52 = vpop.f32.mrb[10].mxu1  ;;  %v2010_v53 = vpop.f32.mrb[11].mxu0 }
 0x13a   :  { %v1061_v54 = vadd.f32 %v2008_v48, %v1021_v44  ;;  %v2032_v55 = vpop.f32.mrb[11].mxu1  ;;  %v2264_v48 = vld [vmem:[%s2830_s7 + $0x8] sm:$0xff]   ;;  %v2265_v53 = vld [vmem:[%s2830_s7 + $0x10] sm:$0xff]  }
 0x13b   :  { %v2266_v55 = vld [vmem:[%s2830_s7 + $0x18] sm:$0xff]  }
 0x13c   :  { %v1101_v56 = vadd.f32 %v2030_v51, %v1061_v54 }
 0x147   :  { %v1140_v58 = vpop.f32.mrb[12].mxu1 }
 0x148   :  { %v1141_v59 = vadd.f32 %v1140_v58, %v1101_v56  ;;  %v2102_v60 = vpop.f32.mrb[13].mxu1  ;;  %v2267_v56 = vld [vmem:[%s2830_s7 + $0x20] sm:$0xff]   ;;  %v2268_v58 = vld [vmem:[%s2830_s7 + $0x28] sm:$0xff]  }
 0x149   :  { %v1143_v61 = vpop.f32.mrb[14].mxu1  ;;  %v2270_v60 = vld [vmem:[%s2830_s7 + $0x38] sm:$0xff]  }
 0x14a   :  { %v1146_v62 = vmax.f32 %v1141_v59, 0.0  ;;  %v2103_v63 = vpop.f32.mrb[15].mxu1  ;;  %v2269_v59 = vld [vmem:[%s2830_s7 + $0x30] sm:$0xff]  }
 0x14c   :  { %v1147_v0 = vpack.c.bf16 %v1146_v62, %v1146_v62 }
 0x14e   :  { %1857 = vmatmul.mubr.msk.bf16.vlgmr.msra.gmra.mrb[16].mxu1 %vm1182_vm3, %v1147_v0 }
 0x14f   :  { %1241 = vmatpush1.bf16.msra.mxu1 %v2676_v7  ;;  %1272 = vmatprep.mubr.bf16.mxu1 %v2273_v4  ;;  %v2244_v4 = vld [vmem:[%s2828_s5 + $0xd0] sm:$0xff]   ;;  %v2248_v7 = vld [vmem:[%s2828_s5 + $0xd8] sm:$0xff]  }
 0x150   :  { %2061 = vmatprep.subr.bf16.mxu1 %v2236_v1 }
 0x156   :  { %1859 = vmatmul.mubr.msk.bf16.vlgmr.msra.gmra.mrb[20].mxu1 %vm1182_vm3, %v1147_v0 }
 0x157   :  { %2062 = vmatpush3.bf16.msra.mxu1 %v2238_v2  ;;  %v1860_v2 = vld [vmem:[%s2832_s6] ss:$0 sm:$0xff] }
 0x158   :  { %2063 = vmatprep.subr.bf16.mxu1 %v2240_v3 }
 0x15b   :  { %2064 = vmatpush3.bf16.msra.mxu1 %v2242_v5 }
 0x15c   :  { %2065 = vmatprep.subr.bf16.mxu1 %v2244_v4 }
 0x15f   :  { %2066 = vmatpush3.bf16.msra.mxu1 %v2246_v6 }
 0x160   :  { %2067 = vmatprep.subr.bf16.mxu1 %v2248_v7 }
 0x163   :  { %2068 = vmatpush3.bf16.msra.mxu1 %v2250_v8 }
 0x164   :  { %2069 = vmatprep.subr.bf16.mxu1 %v2252_v10 }
 0x167   :  { %2070 = vmatpush3.bf16.msra.mxu1 %v2254_v12 }
 0x168   :  { %2071 = vmatprep.subr.bf16.mxu1 %v2256_v14 }
 0x16b   :  { %2072 = vmatpush3.bf16.msra.mxu1 %v2258_v16 }
 0x16c   :  { %2073 = vmatprep.subr.bf16.mxu1 %v2259_v17 }
 0x16f   :  { %2074 = vmatpush3.bf16.msra.mxu1 %v2260_v18 }
 0x170   :  { %2075 = vmatprep.subr.bf16.mxu1 %v2261_v19 }
 0x173   :  { %2076 = vmatpush3.bf16.msra.mxu1 %v2262_v20 }
 0x221   :  { %v1233_v28 = vpop.f32.mrb[16].mxu1 }
 0x222   :  { %v1234_v29 = vadd.f32 %v1233_v28, %v1155_v26  ;;  %v1235_v30 = vpop.f32.mrb[17].mxu1 }
 0x223   :  { %v1236_v32 = vadd.f32 %v1235_v30, %v1159_v27  ;;  %v1237_v33 = vpop.f32.mrb[18].mxu1 }
 0x224   :  { %v1281_v35 = vmax.f32 %v1234_v29, 0.0  ;;  %v1238_v36 = vpop.f32.mrb[19].mxu1 }
 0x225   :  { %v1282_v37 = vmax.f32 %v1236_v32, 0.0 }
 0x226   :  { %v1285_v42 = vpack.c.bf16 %v1281_v35, %v1281_v35 }
 0x227   :  { %v1286_v39 = vpack.c.bf16 %v1282_v37, %v1282_v37 }
 0x229   :  { %v1274_v43 = vpop.f32.mrb[20].mxu1  ;;  %1584 = vmatprep.mubr.bf16.mxu0 %v1286_v39 }
 0x22a   :  { %v1275_v44 = vadd.f32 %v1274_v43, %v1163_v38  ;;  %v1276_v45 = vpop.f32.mrb[21].mxu1  ;;  %1585 = vmatmul.mubr.bf16.vlgmr.msra.gmra.mrb[12].mxu0 %v1285_v42 }
 0x22b   :  { %v1277_v46 = vadd.f32 %v1276_v45, %v1167_v40  ;;  %v1278_v47 = vpop.f32.mrb[22].mxu1  ;;  %2105 = vmatpush3.bf16.msra.mxu0 %v2263_v41  ;;  %2120 = vmatprep.mubr.msk.bf16.mxu0 %vm2272_vm0, %v2271_v57 }
 0x22c   :  { %v1283_v49 = vmax.f32 %v1275_v44, 0.0  ;;  %v1279_v50 = vpop.f32.mrb[23].mxu1  ;;  %2106 = vmatprep.subr.bf16.mxu0 %v2271_v57 }
 0x22d   :  { %v1284_v51 = vmax.f32 %v1277_v46, 0.0 }
 0x22e   :  { %v1287_v54 = vpack.c.bf16 %v1283_v49, %v1283_v49 }
 0x22f   :  { %v1288_v52 = vpack.c.bf16 %v1284_v51, %v1284_v51  ;;  %2107 = vmatpush3.bf16.msra.mxu0 %v2264_v48 }
 0x230   :  { %2108 = vmatprep.subr.bf16.mxu0 %v2271_v57 }
 0x231   :  { %1624 = vmatprep.mubr.bf16.mxu1 %v1288_v52 }
 0x232   :  { %1625 = vmatmul.mubr.bf16.vlgmr.msra.gmra.mrb[24].mxu1 %v1287_v54 }
 0x233   :  { %2109 = vmatpush3.bf16.msra.mxu0 %v2265_v53 }
 0x234   :  { %2110 = vmatprep.subr.bf16.mxu0 %v2271_v57 }
 0x237   :  { %2111 = vmatpush3.bf16.msra.mxu0 %v2266_v55 }
 0x238   :  { %2112 = vmatprep.subr.bf16.mxu0 %v2271_v57 }
 0x23b   :  { %2113 = vmatpush3.bf16.msra.mxu0 %v2267_v56 }
 0x23c   :  { %2114 = vmatprep.subr.bf16.mxu0 %v2271_v57 }
 0x23f   :  { %2115 = vmatpush3.bf16.msra.mxu0 %v2268_v58 }
 0x240   :  { %2116 = vmatprep.subr.bf16.mxu0 %v2271_v57 }
 0x243   :  { %2117 = vmatpush3.bf16.msra.mxu0 %v2269_v59 }
 0x244   :  { %2118 = vmatprep.subr.bf16.mxu0 %v2271_v57 }
 0x247   :  { %2119 = vmatpush3.bf16.msra.mxu0 %v2270_v60 }
 0x2fd   :  { %v2055_v61 = vpop.f32.mrb[12].mxu0 }
 0x2fe   :  { %v2056_v62 = vpop.f32.mrb[13].mxu0 }
 0x2ff   :  { %v2057_v63 = vadd.f32 %v2056_v62, %v2055_v61  ;;  %v2058_v0 = vpop.f32.mrb[14].mxu0 }
 0x300   :  { %v2059_v1 = vpop.f32.mrb[15].mxu0 }
 0x301   :  { %v1587_v4 = vadd.f32 %v2057_v63, %v1860_v2 }
 0x305   :  { %v2077_v3 = vpop.f32.mrb[24].mxu1 }
 0x306   :  { %v2078_v5 = vpop.f32.mrb[25].mxu1 }
 0x307   :  { %v2079_v6 = vadd.f32 %v2078_v5, %v2077_v3  ;;  %v2080_v7 = vpop.f32.mrb[26].mxu1 }
 0x308   :  { %v2081_v57 = vpop.f32.mrb[27].mxu1 }
 0x309   :  { %v1627_v8 = vadd.f32 %v2079_v6, %v1587_v4 }
 0x30b   :  { %v1632_v9 = vmax.f32 %v1627_v8, 0.0 }
 0x30d   :  { %v1633_v10 = vpack.c.bf16 %v1632_v9, %v1632_v9 }
 0x30f   :  { %2121 = vmatmul.mubr.bf16.vlgmr.msra.gmra.mrb[16].mxu0 %v1633_v10 }
 0x3e2   :  { %v1739_v12 = vpop.f32.mrb[16].mxu0 }
 0x3e3   :  { %v1740_v13 = vadd.f32 %v1893_v11, %v1739_v12  ;;  %v2122_v14 = vpop.f32.mrb[17].mxu0 }
 0x3e4   :  { %v1742_v15 = vpop.f32.mrb[18].mxu0 }
 0x3e5   :  { %v1745_v16 = vpack.c.bf16 %v1740_v13, %v1740_v13  ;;  %v2123_v17 = vpop.f32.mrb[19].mxu0 }
 0x3e7   :  { %1746 = vst [vmem:[%s2834_s9] sm:$0xf] %v1745_v16 }

</bundles_post_ra>
